<compile_context>
chip_gen: v5e
topology: v5e:2x2
jax: 0.10.0
libtpu: 0.0.40
codegen_flags: <defaults>
</compile_context>

<pallas_src>
import functools
import math

import jax
import jax.numpy as jnp
from jax.experimental import pallas as pl
from jax.experimental.pallas import tpu as pltpu


# ------------------------------ in-kernel math ------------------------------

def _layernorm(x, g, b, eps=1e-5):
    mu = jnp.mean(x, axis=-1, keepdims=True)
    var = jnp.mean((x - mu) ** 2, axis=-1, keepdims=True)
    return (x - mu) * jax.lax.rsqrt(var + eps) * g + b


def _erf(z):
    # Abramowitz & Stegun 7.1.26 (|error| < 1.5e-7), built only from ops with
    # guaranteed Mosaic lowerings (EUP exp + VPU polynomial/select); well
    # below the bf16 noise floor of the surrounding matmuls.
    a1, a2, a3, a4, a5 = (0.254829592, -0.284496736, 1.421413741,
                          -1.453152027, 1.061405429)
    p = 0.3275911
    s = jnp.where(z >= 0.0, 1.0, -1.0)
    az = jnp.abs(z)
    t = 1.0 / (1.0 + p * az)
    poly = ((((a5 * t + a4) * t + a3) * t + a2) * t + a1) * t
    return s * (1.0 - poly * jnp.exp(-az * az))


def _gelu_erf(x):
    # Exact-erf gelu used by the reference: x * 0.5 * (1 + erf(x / sqrt(2))).
    return x * 0.5 * (1.0 + _erf(x * (1.0 / math.sqrt(2.0))))


# ------------------------------ pass 1 kernel -------------------------------

def qkv_proj_kernel(x_ref, g1_ref, b1_ref, wq_ref, wk_ref, wv_ref,
                    q_ref, k_ref, v_ref, *, num_heads):
    tn, c = x_ref.shape[1], x_ref.shape[2]
    hd = c // num_heads

    x = x_ref[0].astype(jnp.float32)                               # (tn, C)
    h = _layernorm(x, g1_ref[...], b1_ref[...]).astype(jnp.bfloat16)

    # Full-width (tn, C) @ (C, C) projections keep the MXU contraction/output
    # dimensions full; the softmax scale is pre-folded into wq.
    q = jnp.dot(h, wq_ref[...], preferred_element_type=jnp.float32)
    k = jnp.dot(h, wk_ref[...], preferred_element_type=jnp.float32)
    v = jnp.dot(h, wv_ref[...], preferred_element_type=jnp.float32)

    # Head-major relayouts are paid once per token HERE (not once per q-tile
    # in the attention pass).  (C, tn) -> (heads, hd, tn) only splits the
    # leading dim, so the real data movement is the 2-D transposes themselves.
    qT = jnp.transpose(q.astype(jnp.bfloat16)).reshape(num_heads, hd, tn)
    kT = jnp.transpose(k.astype(jnp.bfloat16)).reshape(num_heads, hd, tn)
    vT = jnp.transpose(v.astype(jnp.bfloat16)).reshape(num_heads, hd, tn)
    q_ref[0] = jnp.transpose(qT, (0, 2, 1))                        # (h, tn, hd)
    k_ref[0] = kT                                                  # (h, hd, tn)
    v_ref[0] = jnp.transpose(vT, (0, 2, 1))                        # (h, tn, hd)


# ------------------------------ pass 2 kernel -------------------------------

def attn_mlp_kernel(x_ref, q_ref, k_ref, v_ref, wp_ref, bp_ref,
                    g2_ref, b2_ref, w1_ref, fb1_ref, w2_ref, fb2_ref, o_ref):
    x = x_ref[0].astype(jnp.float32)                               # (TN, C)
    q = q_ref[0]                                                   # (h, TN, hd) bf16, scale folded
    kT = k_ref[0]                                                  # (h, hd, N)  bf16, lane-dense N
    v = v_ref[0]                                                   # (h, N, hd)  bf16

    # ---- attention: batched head einsums, no in-kernel transposes ----------
    s = jnp.einsum('hqd,hdk->hqk', q, kT,
                   preferred_element_type=jnp.float32)             # (h, TN, N)
    s = s - jnp.max(s, axis=-1, keepdims=True)
    p = jnp.exp(s)
    p = p * pl.reciprocal(jnp.sum(p, axis=-1, keepdims=True), approx=True)
    ao = jnp.einsum('hqk,hkd->hqd', p.astype(jnp.bfloat16), v,
                    preferred_element_type=jnp.float32)            # (h, TN, hd)

    # Output projection: per-head batched matmul + reduction over heads.
    # (Canonical-rank spelling of einsum('hqd,hdc->qc'); a single dot_general
    # with two contracting dims is not lowerable by Mosaic.)
    proj = jnp.einsum('hqd,hdc->hqc', ao.astype(jnp.bfloat16), wp_ref[...],
                      preferred_element_type=jnp.float32)          # (h, TN, C)
    x1 = x + jnp.sum(proj, axis=0) + bp_ref[...]                   # residual 1

    # ---- MLP ----------------------------------------------------------------
    h2 = _layernorm(x1, g2_ref[...], b2_ref[...]).astype(jnp.bfloat16)
    m = jnp.dot(h2, w1_ref[...],
                preferred_element_type=jnp.float32) + fb1_ref[...]
    m = _gelu_erf(m).astype(jnp.bfloat16)
    m = jnp.dot(m, w2_ref[...],
                preferred_element_type=jnp.float32) + fb2_ref[...]
    o_ref[0] = (x1 + m).astype(o_ref.dtype)                        # residual 2


# ------------------------------ host wrapper --------------------------------

def _vmem_limit_bytes():
    """Generation-aware VMEM limit: ~52 MiB on v7x (64 MiB physical per core),
    ~110 MiB on v5e/v6e (128 MiB physical).  Only tunes the advisory compiler
    limit and the tile choice; never changes kernel semantics."""
    cap = 64 * 1024 * 1024                     # conservative default (v7x)
    if hasattr(pltpu, "get_tpu_info"):
        try:
            cap = int(getattr(pltpu.get_tpu_info(), "vmem_capacity_bytes", cap))
        except Exception:                      # hardware-info probe only
            pass
    return int(max(32 * 1024 * 1024,
                   min(cap - 12 * 1024 * 1024, 110 * 1024 * 1024)))


def _pick_q_tile(n, fits):
    """q-row tile for the attention/MLP pass: prefer 256 (v6e/v7x MXU is
    256x256 and 256 is also a multiple of v5e's 128), then 128, then the
    largest multiple-of-8 divisor of n whose working set fits the budget."""
    cands = [t for t in (256, 128) if n % t == 0]
    cands += [t for t in range(n - n % 8, 7, -8)
              if n % t == 0 and t not in cands]
    for t in cands:
        if fits(t):
            return t
    return min(cands) if cands else n


def block_forward(x, params, *, num_heads, epoch=0, q_tile=None):
    """Forward pass of TransGAN_im2im.Block (is_mask=0, dropout=0)."""
    # TODO(synk): epoch-scheduled local-attention masks (is_mask > 0) are not
    # implemented; this module configuration uses is_mask=0 so `epoch` is a
    # no-op in the forward pass.
    del epoch
    B, N, C = x.shape
    assert C % num_heads == 0
    hd = C // num_heads
    H = params["w1"].shape[1]
    scale = hd ** (-0.5)

    # Weight prep (trace-time, free): split Wqkv, fold softmax scale into Wq,
    # reshape the proj weight per head, cast matmul weights to bf16.
    wqkv = params["wqkv"].astype(jnp.float32)
    wq = (wqkv[:, 0:C] * scale).astype(jnp.bfloat16)               # (C, C)
    wk = wqkv[:, C:2 * C].astype(jnp.bfloat16)                     # (C, C)
    wv = wqkv[:, 2 * C:3 * C].astype(jnp.bfloat16)                 # (C, C)
    wp = params["wproj"].reshape(num_heads, hd, C).astype(jnp.bfloat16)
    w1 = params["w1"].astype(jnp.bfloat16)                         # (C, H)
    w2 = params["w2"].astype(jnp.bfloat16)                         # (H, C)

    vmem_limit = _vmem_limit_bytes()

    # ---------------- pass 1: LN1 + QKV projection ----------------
    # K's last (lane) dim is the sequence, so its seq tile must be a multiple
    # of 128 or the whole sequence.
    TNK = 256 if N % 256 == 0 else (128 if N % 128 == 0 else N)

    qkv_cost = pl.CostEstimate(
        flops=int(2 * B * N * C * 3 * C),
        transcendentals=int(B * N),
        bytes_accessed=int(B * N * C * 4 + 3 * B * N * C * 2 + 3 * C * C * 2))

    q_hm, k_hm, v_hm = pl.pallas_call(
        functools.partial(qkv_proj_kernel, num_heads=num_heads),
        out_shape=(
            jax.ShapeDtypeStruct((B, num_heads, N, hd), jnp.bfloat16),   # Q
            jax.ShapeDtypeStruct((B, num_heads, hd, N), jnp.bfloat16),   # K^T
            jax.ShapeDtypeStruct((B, num_heads, N, hd), jnp.bfloat16),   # V
        ),
        grid_spec=pltpu.PrefetchScalarGridSpec(
            num_scalar_prefetch=0,
            grid=(B, N // TNK),
            in_specs=[
                pl.BlockSpec((1, TNK, C), lambda b, s: (b, s, 0)),
                pl.BlockSpec((1, C), lambda b, s: (0, 0)),
                pl.BlockSpec((1, C), lambda b, s: (0, 0)),
                pl.BlockSpec((C, C), lambda b, s: (0, 0)),
                pl.BlockSpec((C, C), lambda b, s: (0, 0)),
                pl.BlockSpec((C, C), lambda b, s: (0, 0)),
            ],
            out_specs=[
                pl.BlockSpec((1, num_heads, TNK, hd), lambda b, s: (b, 0, s, 0)),
                pl.BlockSpec((1, num_heads, hd, TNK), lambda b, s: (b, 0, 0, s)),
                pl.BlockSpec((1, num_heads, TNK, hd), lambda b, s: (b, 0, s, 0)),
            ]),
        compiler_params=pltpu.CompilerParams(
            dimension_semantics=("parallel", "parallel"),
            vmem_limit_bytes=vmem_limit),
        cost_estimate=qkv_cost,
    )(x, params["ln1_g"], params["ln1_b"], wq, wk, wv)

    # ---------------- pass 2: attention + MLP + residuals ----------------
    def attn_fits(tn):
        buf = 2 * (2 * tn * C * 4)               # x tile in + out tile (f32)
        buf += 2 * tn * C * 2                    # q tile (bf16)
        buf += 2 * 2 * N * C * 2                 # K + V (bf16, full per b)
        buf += 2 * (C * C + 2 * C * H) * 2       # wp/fc1/fc2 (bf16, 2 buffers)
        inter = 2 * num_heads * tn * N * 4       # logits + probs (f32)
        inter += num_heads * tn * C * 4          # per-head proj pre-reduce
        inter += 2 * tn * H * 4                  # fc1 activations (f32)
        inter += 6 * tn * C * 4                  # x/x1/h2/misc f32 temporaries
        return buf + inter <= vmem_limit

    TN = q_tile if q_tile is not None else _pick_q_tile(N, attn_fits)
    assert N % TN == 0 and (TN == N or TN % 8 == 0), (N, TN)

    attn_cost = pl.CostEstimate(
        flops=int(4 * B * N * N * C + 2 * B * N * C * (C + 2 * H)),
        transcendentals=int(B * N * (num_heads * N + H)),
        bytes_accessed=int(2 * B * N * C * 4 + 3 * B * N * C * 2
                           + (C * C + 2 * C * H) * 2))

    return pl.pallas_call(
        attn_mlp_kernel,
        out_shape=jax.ShapeDtypeStruct((B, N, C), x.dtype),
        grid_spec=pltpu.PrefetchScalarGridSpec(
            num_scalar_prefetch=0,
            grid=(B, N // TN),
            in_specs=[
                pl.BlockSpec((1, TN, C), lambda b, s: (b, s, 0)),             # x
                pl.BlockSpec((1, num_heads, TN, hd), lambda b, s: (b, 0, s, 0)),  # Q tile
                pl.BlockSpec((1, num_heads, hd, N), lambda b, s: (b, 0, 0, 0)),   # K^T
                pl.BlockSpec((1, num_heads, N, hd), lambda b, s: (b, 0, 0, 0)),   # V
                pl.BlockSpec((num_heads, hd, C), lambda b, s: (0, 0, 0)),     # wproj
                pl.BlockSpec((1, C), lambda b, s: (0, 0)),                    # bproj
                pl.BlockSpec((1, C), lambda b, s: (0, 0)),                    # ln2_g
                pl.BlockSpec((1, C), lambda b, s: (0, 0)),                    # ln2_b
                pl.BlockSpec((C, H), lambda b, s: (0, 0)),                    # w1
                pl.BlockSpec((1, H), lambda b, s: (0, 0)),                    # b1
                pl.BlockSpec((H, C), lambda b, s: (0, 0)),                    # w2
                pl.BlockSpec((1, C), lambda b, s: (0, 0)),                    # b2
            ],
            out_specs=pl.BlockSpec((1, TN, C), lambda b, s: (b, s, 0))),
        compiler_params=pltpu.CompilerParams(
            dimension_semantics=("parallel", "parallel"),
            vmem_limit_bytes=vmem_limit),
        cost_estimate=attn_cost,
    )(x, q_hm, k_hm, v_hm, wp, params["bproj"], params["ln2_g"],
      params["ln2_b"], w1, params["b1"], w2, params["b2"])


# ------------------------------ reference path ------------------------------

def ref_forward(x, params, *, num_heads):
    # Pure-JAX f32 reference mirroring the PyTorch module semantics.
    B, N, C = x.shape
    hd = C // num_heads
    scale = hd ** (-0.5)

    def ln(v, g, b):
        mu = v.mean(-1, keepdims=True)
        var = ((v - mu) ** 2).mean(-1, keepdims=True)
        return (v - mu) / jnp.sqrt(var + 1e-5) * g + b

    h = ln(x, params["ln1_g"], params["ln1_b"])
    qkv = h @ params["wqkv"]                                         # (B,N,3C)
    qkv = qkv.reshape(B, N, 3, num_heads, hd).transpose(2, 0, 3, 1, 4)
    q, k, v = qkv[0], qkv[1], qkv[2]                                 # (B,h,N,hd)
    attn = (q @ jnp.swapaxes(k, -2, -1)) * scale
    attn = jax.nn.softmax(attn, axis=-1)
    ao = (attn @ v).transpose(0, 2, 1, 3).reshape(B, N, C)
    ao = ao @ params["wproj"] + params["bproj"]
    x1 = x + ao

    h2 = ln(x1, params["ln2_g"], params["ln2_b"])
    m = h2 @ params["w1"] + params["b1"]
    m = m * 0.5 * (1.0 + jax.lax.erf(m / math.sqrt(2.0)))
    m = m @ params["w2"] + params["b2"]
    return x1 + m


def make_params(key, dim, num_heads, mlp_ratio=4.0):
    hidden = int(dim * mlp_ratio)
    ks = jax.random.split(key, 8)
    s = 0.05
    return {
        "ln1_g": jnp.ones((1, dim), jnp.float32),
        "ln1_b": jnp.zeros((1, dim), jnp.float32),
        # qkv Linear: qkv_bias=False, torch weight (3C, C) -> transposed (C, 3C)
        "wqkv": jax.random.normal(ks[0], (dim, 3 * dim), jnp.float32) * s,
        "wproj": jax.random.normal(ks[1], (dim, dim), jnp.float32) * s,
        "bproj": jax.random.normal(ks[2], (1, dim), jnp.float32) * s,
        "ln2_g": jnp.ones((1, dim), jnp.float32),
        "ln2_b": jnp.zeros((1, dim), jnp.float32),
        "w1": jax.random.normal(ks[3], (dim, hidden), jnp.float32) * s,
        "b1": jax.random.normal(ks[4], (1, hidden), jnp.float32) * s,
        "w2": jax.random.normal(ks[5], (hidden, dim), jnp.float32) * s,
        "b2": jax.random.normal(ks[6], (1, dim), jnp.float32) * s,
    }


if __name__ == "__main__":
    B, N, C = 2, 16, 32
    num_heads = 4

    key = jax.random.PRNGKey(0)
    kx, kp = jax.random.split(key)
    x = jax.random.normal(kx, (B, N, C), jnp.float32)
    params = make_params(kp, C, num_heads)

    # q_tile=8 exercises the q-tiled attention path (grid = (B, 2)); the QKV
    # pass runs untiled over the 16-token sequence.
    out = block_forward(x, params, num_heads=num_heads, epoch=100, q_tile=8)
    out = jax.block_until_ready(out)

    ref = ref_forward(x, params, num_heads=num_heads)
    assert out.shape == (B, N, C)
    max_err = float(jnp.max(jnp.abs(out - ref)))
    # bf16 MXU operands + approx softmax reciprocal -> loosened tolerance vs
    # the f32 reference.
    assert jnp.allclose(out, ref, rtol=2e-2, atol=2e-2), max_err

    print("KERNEL_OK")
</pallas_src>

<mosaic_0001>
module attributes {stable_mosaic.version = 11 : i64} {
  func.func @qkv_proj_kernel(%arg0: i32, %arg1: i32, %arg2: memref<1x16x32xf32, #tpu.memory_space<vmem>>, %arg3: memref<1x32xf32, #tpu.memory_space<vmem>>, %arg4: memref<1x32xf32, #tpu.memory_space<vmem>>, %arg5: memref<32x32xbf16, #tpu.memory_space<vmem>>, %arg6: memref<32x32xbf16, #tpu.memory_space<vmem>>, %arg7: memref<32x32xbf16, #tpu.memory_space<vmem>>, %arg8: memref<1x4x16x8xbf16, #tpu.memory_space<vmem>>, %arg9: memref<1x4x8x16xbf16, #tpu.memory_space<vmem>>, %arg10: memref<1x4x16x8xbf16, #tpu.memory_space<vmem>>) attributes {dimension_semantics = [#tpu.dimension_semantics<parallel>, #tpu.dimension_semantics<parallel>], iteration_bounds = array<i64: 2, 1>, scalar_prefetch = 0 : i64, scratch_operands = 0 : i64, tpu.core_type = #tpu.core_type<tc>, window_params = [{transform_indices = @transform_0, window_bounds = array<i64: 1, 16, 32>}, {pipeline_mode = #tpu.pipeline_mode<synchronous>, transform_indices = @transform_1, window_bounds = array<i64: 1, 32>}, {pipeline_mode = #tpu.pipeline_mode<synchronous>, transform_indices = @transform_2, window_bounds = array<i64: 1, 32>}, {pipeline_mode = #tpu.pipeline_mode<synchronous>, transform_indices = @transform_3, window_bounds = array<i64: 32, 32>}, {pipeline_mode = #tpu.pipeline_mode<synchronous>, transform_indices = @transform_4, window_bounds = array<i64: 32, 32>}, {pipeline_mode = #tpu.pipeline_mode<synchronous>, transform_indices = @transform_5, window_bounds = array<i64: 32, 32>}, {transform_indices = @transform_6, window_bounds = array<i64: 1, 4, 16, 8>}, {transform_indices = @transform_7, window_bounds = array<i64: 1, 4, 8, 16>}, {transform_indices = @transform_8, window_bounds = array<i64: 1, 4, 16, 8>}]} {
    %c0 = arith.constant 0 : index
    %c0_0 = arith.constant 0 : index
    %c0_1 = arith.constant 0 : index
    %0 = vector.load %arg2[%c0, %c0_0, %c0_1] : memref<1x16x32xf32, #tpu.memory_space<vmem>>, vector<1x16x32xf32>
    %1 = vector.shape_cast %0 : vector<1x16x32xf32> to vector<16x32xf32>
    %c0_2 = arith.constant 0 : index
    %c0_3 = arith.constant 0 : index
    %2 = vector.load %arg3[%c0_2, %c0_3] : memref<1x32xf32, #tpu.memory_space<vmem>>, vector<1x32xf32>
    %c0_4 = arith.constant 0 : index
    %c0_5 = arith.constant 0 : index
    %3 = vector.load %arg4[%c0_4, %c0_5] : memref<1x32xf32, #tpu.memory_space<vmem>>, vector<1x32xf32>
    %cst = arith.constant dense<0.000000e+00> : vector<16xf32>
    %4 = vector.multi_reduction <add>, %1, %cst [1] : vector<16x32xf32> to vector<16xf32>
    %5 = vector.shape_cast %4 : vector<16xf32> to vector<16x1xf32>
    %cst_6 = arith.constant 3.200000e+01 : f32
    %6 = vector.broadcast %cst_6 : f32 to vector<16x1xf32>
    %7 = arith.divf %5, %6 : vector<16x1xf32>
    %8 = vector.broadcast %7 : vector<16x1xf32> to vector<16x32xf32>
    %9 = arith.subf %1, %8 : vector<16x32xf32>
    %10 = arith.mulf %9, %9 : vector<16x32xf32>
    %cst_7 = arith.constant dense<0.000000e+00> : vector<16xf32>
    %11 = vector.multi_reduction <add>, %10, %cst_7 [1] : vector<16x32xf32> to vector<16xf32>
    %12 = vector.shape_cast %11 : vector<16xf32> to vector<16x1xf32>
    %cst_8 = arith.constant 3.200000e+01 : f32
    %13 = vector.broadcast %cst_8 : f32 to vector<16x1xf32>
    %14 = arith.divf %12, %13 : vector<16x1xf32>
    %15 = vector.broadcast %7 : vector<16x1xf32> to vector<16x32xf32>
    %16 = arith.subf %1, %15 : vector<16x32xf32>
    %cst_9 = arith.constant 9.99999974E-6 : f32
    %17 = vector.broadcast %cst_9 : f32 to vector<16x1xf32>
    %18 = arith.addf %14, %17 : vector<16x1xf32>
    %19 = math.rsqrt %18 : vector<16x1xf32>
    %20 = vector.broadcast %19 : vector<16x1xf32> to vector<16x32xf32>
    %21 = arith.mulf %16, %20 : vector<16x32xf32>
    %22 = vector.broadcast %2 : vector<1x32xf32> to vector<16x32xf32>
    %23 = arith.mulf %21, %22 : vector<16x32xf32>
    %24 = vector.broadcast %3 : vector<1x32xf32> to vector<16x32xf32>
    %25 = arith.addf %23, %24 : vector<16x32xf32>
    %26 = arith.truncf %25 : vector<16x32xf32> to vector<16x32xbf16>
    %c0_10 = arith.constant 0 : index
    %c0_11 = arith.constant 0 : index
    %27 = vector.load %arg5[%c0_10, %c0_11] : memref<32x32xbf16, #tpu.memory_space<vmem>>, vector<32x32xbf16>
    %cst_12 = arith.constant dense<0.000000e+00> : vector<16x32xf32>
    %28 = tpu.matmul %26, %27, %cst_12 {dimension_numbers = #tpu.dot_dimension_numbers<[1], [0], [0], [1], [0, 0, 1, 1], [], []>} : vector<16x32xbf16>, vector<32x32xbf16>, vector<16x32xf32> -> vector<16x32xf32>
    %c0_13 = arith.constant 0 : index
    %c0_14 = arith.constant 0 : index
    %29 = vector.load %arg6[%c0_13, %c0_14] : memref<32x32xbf16, #tpu.memory_space<vmem>>, vector<32x32xbf16>
    %cst_15 = arith.constant dense<0.000000e+00> : vector<16x32xf32>
    %30 = tpu.matmul %26, %29, %cst_15 {dimension_numbers = #tpu.dot_dimension_numbers<[1], [0], [0], [1], [0, 0, 1, 1], [], []>} : vector<16x32xbf16>, vector<32x32xbf16>, vector<16x32xf32> -> vector<16x32xf32>
    %c0_16 = arith.constant 0 : index
    %c0_17 = arith.constant 0 : index
    %31 = vector.load %arg7[%c0_16, %c0_17] : memref<32x32xbf16, #tpu.memory_space<vmem>>, vector<32x32xbf16>
    %cst_18 = arith.constant dense<0.000000e+00> : vector<16x32xf32>
    %32 = tpu.matmul %26, %31, %cst_18 {dimension_numbers = #tpu.dot_dimension_numbers<[1], [0], [0], [1], [0, 0, 1, 1], [], []>} : vector<16x32xbf16>, vector<32x32xbf16>, vector<16x32xf32> -> vector<16x32xf32>
    %33 = arith.truncf %28 : vector<16x32xf32> to vector<16x32xbf16>
    %34 = tpu.transpose %33, [1, 0] : vector<16x32xbf16> -> vector<32x16xbf16>
    %35 = vector.shape_cast %34 : vector<32x16xbf16> to vector<4x8x16xbf16>
    %36 = arith.truncf %30 : vector<16x32xf32> to vector<16x32xbf16>
    %37 = tpu.transpose %36, [1, 0] : vector<16x32xbf16> -> vector<32x16xbf16>
    %38 = vector.shape_cast %37 : vector<32x16xbf16> to vector<4x8x16xbf16>
    %39 = arith.truncf %32 : vector<16x32xf32> to vector<16x32xbf16>
    %40 = tpu.transpose %39, [1, 0] : vector<16x32xbf16> -> vector<32x16xbf16>
    %41 = vector.shape_cast %40 : vector<32x16xbf16> to vector<4x8x16xbf16>
    %42 = tpu.transpose %35, [0, 2, 1] : vector<4x8x16xbf16> -> vector<4x16x8xbf16>
    %c0_19 = arith.constant 0 : index
    %c0_20 = arith.constant 0 : index
    %c0_21 = arith.constant 0 : index
    %c0_22 = arith.constant 0 : index
    %43 = vector.load %arg8[%c0_19, %c0_20, %c0_21, %c0_22] : memref<1x4x16x8xbf16, #tpu.memory_space<vmem>>, vector<1x4x16x8xbf16>
    %44 = vector.shape_cast %43 : vector<1x4x16x8xbf16> to vector<4x16x8xbf16>
    %45 = vector.shape_cast %42 : vector<4x16x8xbf16> to vector<1x4x16x8xbf16>
    tpu.vector_store %arg8[%c0_19, %c0_20, %c0_21, %c0_22], %45 {strides = array<i32>} : memref<1x4x16x8xbf16, #tpu.memory_space<vmem>>, vector<1x4x16x8xbf16>,
    %c0_23 = arith.constant 0 : index
    %c0_24 = arith.constant 0 : index
    %c0_25 = arith.constant 0 : index
    %c0_26 = arith.constant 0 : index
    %46 = vector.load %arg9[%c0_23, %c0_24, %c0_25, %c0_26] : memref<1x4x8x16xbf16, #tpu.memory_space<vmem>>, vector<1x4x8x16xbf16>
    %47 = vector.shape_cast %46 : vector<1x4x8x16xbf16> to vector<4x8x16xbf16>
    %48 = vector.shape_cast %38 : vector<4x8x16xbf16> to vector<1x4x8x16xbf16>
    tpu.vector_store %arg9[%c0_23, %c0_24, %c0_25, %c0_26], %48 {strides = array<i32>} : memref<1x4x8x16xbf16, #tpu.memory_space<vmem>>, vector<1x4x8x16xbf16>,
    %49 = tpu.transpose %41, [0, 2, 1] : vector<4x8x16xbf16> -> vector<4x16x8xbf16>
    %c0_27 = arith.constant 0 : index
    %c0_28 = arith.constant 0 : index
    %c0_29 = arith.constant 0 : index
    %c0_30 = arith.constant 0 : index
    %50 = vector.load %arg10[%c0_27, %c0_28, %c0_29, %c0_30] : memref<1x4x16x8xbf16, #tpu.memory_space<vmem>>, vector<1x4x16x8xbf16>
    %51 = vector.shape_cast %50 : vector<1x4x16x8xbf16> to vector<4x16x8xbf16>
    %52 = vector.shape_cast %49 : vector<4x16x8xbf16> to vector<1x4x16x8xbf16>
    tpu.vector_store %arg10[%c0_27, %c0_28, %c0_29, %c0_30], %52 {strides = array<i32>} : memref<1x4x16x8xbf16, #tpu.memory_space<vmem>>, vector<1x4x16x8xbf16>,
    return
  }
  func.func @transform_0(%arg0: i32, %arg1: i32) -> (i32, i32, i32) {
    %c0_i32 = arith.constant 0 : i32
    %c0_i32_0 = arith.constant 0 : i32
    return %arg0, %arg1, %c0_i32 : i32, i32, i32
  }
  func.func @transform_1(%arg0: i32, %arg1: i32) -> (i32, i32) {
    %c0_i32 = arith.constant 0 : i32
    %c0_i32_0 = arith.constant 0 : i32
    %c0_i32_1 = arith.constant 0 : i32
    return %c0_i32, %c0_i32_0 : i32, i32
  }
  func.func @transform_2(%arg0: i32, %arg1: i32) -> (i32, i32) {
    %c0_i32 = arith.constant 0 : i32
    %c0_i32_0 = arith.constant 0 : i32
    %c0_i32_1 = arith.constant 0 : i32
    return %c0_i32, %c0_i32_0 : i32, i32
  }
  func.func @transform_3(%arg0: i32, %arg1: i32) -> (i32, i32) {
    %c0_i32 = arith.constant 0 : i32
    %c0_i32_0 = arith.constant 0 : i32
    %c0_i32_1 = arith.constant 0 : i32
    return %c0_i32, %c0_i32_0 : i32, i32
  }
  func.func @transform_4(%arg0: i32, %arg1: i32) -> (i32, i32) {
    %c0_i32 = arith.constant 0 : i32
    %c0_i32_0 = arith.constant 0 : i32
    %c0_i32_1 = arith.constant 0 : i32
    return %c0_i32, %c0_i32_0 : i32, i32
  }
  func.func @transform_5(%arg0: i32, %arg1: i32) -> (i32, i32) {
    %c0_i32 = arith.constant 0 : i32
    %c0_i32_0 = arith.constant 0 : i32
    %c0_i32_1 = arith.constant 0 : i32
    return %c0_i32, %c0_i32_0 : i32, i32
  }
  func.func @transform_6(%arg0: i32, %arg1: i32) -> (i32, i32, i32, i32) {
    %c0_i32 = arith.constant 0 : i32
    %c0_i32_0 = arith.constant 0 : i32
    %c0_i32_1 = arith.constant 0 : i32
    return %arg0, %c0_i32, %arg1, %c0_i32_0 : i32, i32, i32, i32
  }
  func.func @transform_7(%arg0: i32, %arg1: i32) -> (i32, i32, i32, i32) {
    %c0_i32 = arith.constant 0 : i32
    %c0_i32_0 = arith.constant 0 : i32
    %c0_i32_1 = arith.constant 0 : i32
    return %arg0, %c0_i32, %c0_i32_0, %arg1 : i32, i32, i32, i32
  }
  func.func @transform_8(%arg0: i32, %arg1: i32) -> (i32, i32, i32, i32) {
    %c0_i32 = arith.constant 0 : i32
    %c0_i32_0 = arith.constant 0 : i32
    %c0_i32_1 = arith.constant 0 : i32
    return %arg0, %c0_i32, %arg1, %c0_i32_0 : i32, i32, i32, i32
  }
}

</mosaic_0001>

<bundles_post_ra>
// kernel: tpu_custom_call.1
= control target key start
LH: loop header
LB: loop body
LE: loop exit
PB: predicated region body
PF: predicated region fallthrough
CT: control target
= control target key end

     0   :  { %s1903_s0 = inlined_call_operand.hbm [shape: f32[2,16,32], index: 0, kind: input, shape index: {}]   ;;  %s1904_s1 = inlined_call_operand.hbm [shape: f32[1,32], index: 1, kind: input, shape index: {}]   ;;  %s1905_s2 = inlined_call_operand.vmem [shape: f32[1,32], index: 2, kind: input, shape index: {}]   ;;  %s1906_s3 = inlined_call_operand.hbm [shape: bf16[32,32], index: 3, kind: input, shape index: {}]   ;;  %s1907_s4 = inlined_call_operand.hbm [shape: bf16[32,32], index: 4, kind: input, shape index: {}]   ;;  %s1908_s5 = inlined_call_operand.hbm [shape: bf16[32,32], index: 5, kind: input, shape index: {}]   ;;  %s1909_s6 = inlined_call_operand.vmem [shape: bf16[2,4,16,8], index: 6, kind: output, shape index: {0}]   ;;  %s1910_s7 = inlined_call_operand.hbm [shape: bf16[2,4,8,16], index: 7, kind: output, shape index: {1}]   ;;  %s1911_s8 = inlined_call_operand.vmem [shape: bf16[2,4,16,8], index: 8, kind: output, shape index: {2}]  }
   0x1   :  { %1914 = sst [smem:[#allocation18_spill]] %s1904_s1 }
   0x2   :  { %1915 = sst [smem:[#allocation19_spill]] %s1906_s3 }
   0x3   :  { %1916 = sst [smem:[#allocation20_spill]] %s1907_s4 }
   0x4   :  { %1917 = sst [smem:[#allocation21_spill]] %s1908_s5 }
   0x5   :  { %14 = vsyncpa [#allocation3], 0 }
   0x6   :  { %16 = vsyncpa [#allocation3 + $0x1], 0 }
   0x7   :  { %17 = vsyncpa [#allocation6], 0 }
   0x8   :  { %18 = vsyncpa [#allocation9], 0 }
   0x9   :  { %19 = vsyncpa [#allocation4], 0 }
   0xa   :  { %21 = vsyncpa [#allocation4 + $0x1], 0  ;;  %s1655_s27 = smov 0   ;;  %s1657_s28 = smov 0  }
   0xb   :  { %s1659_s29 = smov 0   ;;  %s1661_s30 = smov 0  }
   0xc   :  { %s1663_s9 = smov 0   ;;  %s1665_s10 = smov 0  }
   0xd LB: > { %s1157_s11 = sadd.s32 4294967295, %s1597_s10   ;;  %s1158_s12 = sadd.s32 4294967294, %s1597_s10   ;;  %s1597_s10 = sphi %s1665_s10, %s27_s10   ;;  %s1593_s9 = sphi %s1663_s9, %s1938_s9   ;;  %s1589_s30 = sphi %s1661_s30, %s1937_s30   ;;  %s1585_s29 = sphi %s1659_s29, %s1936_s29   ;;  %s1581_s28 = sphi %s1657_s28, %s1935_s28   ;;  %s1577_s27 = sphi %s1655_s27, %s1934_s27  }
   0xe   : > { %p61_p0 = scmp.ne.s32.totalorder %s1581_s28, %s1577_s27  ;;  %p1689_p1 = scmp.eq.s32.totalorder %s1157_s11, 0 }
   0xf   : > { %p1693_p2 = scmp.eq.s32.totalorder %s1157_s11, 1  ;;  %p226_p3 = scmp.eq.s32.totalorder %s1158_s12, 1 }
  0x10   : > { %p1699_p4 = por %p1689_p1, %p61_p0  ;;  %p1159_p5 = scmp.ge.s32.totalorder %s1597_s10, 1 }
  0x11   : > { %p1704_p6 = por %p226_p3, %p61_p0  ;;  %p261_p7 = scmp.lt.s32.totalorder %s1597_s10, 3 }
  0x12   : > { %s1923_s1 = sld [smem:[#allocation18_spill]]  ;;  %p1164_p9 = scmp.ge.s32.totalorder %s1597_s10, 2 }
  0x13   : > { %s1921_s16 = scalar_select %p1704_p6, 1, 0 }
  0x14   : > { %p1712_p8 = pnand %p1159_p5, %p261_p7  ;;  %s1599_s21 = smov [#allocation5]  }
  0x15   : > { %1922 = sst [smem:[#allocation16_spill]] %s1921_s16  ;;  %s275_s22 = sshll.u32 %s1599_s21, 4  ;;  %s276_s22 = int_to_ptr.vmem [resolvable:$true] %s275_s22 }
  0x16   : > { %p1241_p10 = pneg %p1712_p8  ;;  %s1926_s4 = sld [smem:[#allocation20_spill]] }
  0x17   : > { %s1600_s11 = smov [#allocation8]   ;;  %s1927_s3 = sld [smem:[#allocation19_spill]] }
  0x18   : > { %s273_s19 = sshll.u32 %s1923_s1, 4  ;;  %p1721_p11 = pnand %p1241_p10, %p1689_p1  ;;  %s274_s19 = int_to_ptr.hbm [resolvable:$true] %s273_s19 }
  0x19   : > { %s303_s12 = sshll.u32 %s1600_s11, 4  ;;  %s1601_s1 = smov 64   ;;  %s304_s12 = int_to_ptr.vmem [resolvable:$true] %s303_s12 }
  0x1a   : > { %1244 = dma.hbm_to_vmem [thread:$0]  (!%p1721_p11), %s274_s19, 16, %s276_s22, [#allocation6]  }
  0x1b   : > { %s1602_s24 = smov 4   ;;  %s1928_s5 = sld [smem:[#allocation21_spill]] }
  0x1c   : > { %s301_s26 = sshll.u32 %s1926_s4, 4  ;;  %s1603_s11 = smov [#allocation7]   ;;  %s302_s26 = int_to_ptr.hbm [resolvable:$true] %s301_s26 }
  0x1d   : > { %s287_s21 = sshll.u32 %s1927_s3, 4  ;;  %s289_s17 = sshll.u32 %s1603_s11, 4  ;;  %s288_s21 = int_to_ptr.hbm [resolvable:$true] %s287_s21  ;;  %s290_s17 = int_to_ptr.vmem [resolvable:$true] %s289_s17 }
  0x1e   : > { %1250 = dma.hbm_to_vmem [thread:$0]  (!%p1721_p11), %s302_s26, 256, %s304_s12, [#allocation9], %s1601_s1, %s1601_s1, %s1602_s24  }
  0x1f   : > { %1247 = dma.hbm_to_vmem [thread:$0]  (!%p1721_p11), %s288_s21, 256, %s290_s17, [#allocation6], %s1601_s1, %s1601_s1, %s1602_s24  }
  0x20   : > { %s1604_s18 = smov [#allocation10]   ;;  %s39_s26 = sadd.s32 1, %s1593_s9 }
  0x21   : > { %s315_s22 = sshll.u32 %s1928_s5, 4  ;;  %s317_s3 = sshll.u32 %s1604_s18, 4  ;;  %s316_s22 = int_to_ptr.hbm [resolvable:$true] %s315_s22  ;;  %s318_s3 = int_to_ptr.vmem [resolvable:$true] %s317_s3 }
  0x22   : > { %1253 = dma.hbm_to_vmem [thread:$0]  (!%p1721_p11), %s316_s22, 256, %s318_s3, [#allocation9], %s1601_s1, %s1601_s1, %s1602_s24  }
  0x23   : > { %s48_s12 = sadd.s32 1, %s1585_s29  ;;  %p41_p12 = scmp.ge.s32.totalorder %s39_s26, 2 }
  0x24   : > { %p55_p13 = scmp.ne.s32.totalorder %s1585_s29, %s1581_s28  ;;  %p56_p0 = scmp.eq.s32.totalorder %s1597_s10, 0 }
  0x25   : > { %p1266_p3 = scmp.lt.s32.totalorder %s1597_s10, 2  ;;  %s1940_s26 = smov (%p41_p12, %s39_s26), 0 }
  0x26   : > { %1929 = sst [smem:[#allocation17_spill]] %s1940_s26  ;;  %p1750_p5 = por %p56_p0, %p55_p13 }
  0x27   : > { %p1756_p7 = por %p1693_p2, %p55_p13  ;;  %s43_s1 = ssub.s32 %s1593_s9, %s1940_s26 }
  0x28   : > { %s331_s3 = sand.u32 1, %s1585_s29   ;;  %p46_p10 = scmp.eq.s32.totalorder %s43_s1, 0 }
  0x29   : > { %s1165_s21 = sshll.u32 %s331_s3, 4  ;;  %s1211_s24 = sshll.u32 %s1593_s9, 4 }
  0x2a   : > { %s1765_s19 = scalar_select %p46_p10, %s1585_s29, %s48_s12  }
  0x2b   : > { %s342_s17 = scalar_lea.hbm %s1903_s0, %s1211_s24  ;;  %s335_s4 = scalar_lea.vmem [#allocation2], %s1165_s21 }
  0x2c   : > { %s343_s18 = sshll.u32 %s342_s17, 4  ;;  %s345_s5 = sshll.u32 %s335_s4, 4  ;;  %s344_s18 = int_to_ptr.hbm [resolvable:$true] %s343_s18  ;;  %s346_s5 = int_to_ptr.vmem [resolvable:$true] %s345_s5 }
  0x2d   : > { %p1255_p2 = pnand %p1266_p3, %p1750_p5  ;;  %s332_s14 = scalar_lea.sflag [#allocation3], %s331_s3 }
  0x2e   : > { %s1605_s26 = smov 128   ;;  %s1606_s16 = smov 8  }
  0x2f   : > { %1257 = dma.hbm_to_vmem [thread:$0]  (!%p1255_p2), %s344_s18, 256, %s346_s5, %s332_s14, %s1605_s26, %s1605_s26, %s1606_s16  }
  0x30   : > { %357 = sbr.rel (%p1712_p8) target bundleno = 874 (0x36a), region = 44  ;;  %s1777_s12 = sand.u32 (!%p1712_p8), 1, %s1581_s28  }
  0x31   : > { %s1169_s4 = sshll.u32 (!%p1712_p8), %s1777_s12, 4  ;;  %s360_s1 = scalar_lea.sflag (!%p1712_p8), [#allocation3], %s1777_s12 }
  0x32   : > { %s363_s25 = scalar_lea.vmem (!%p1712_p8), [#allocation2], %s1169_s4 }
  0x35   : > { %1560 = dma.done.wait (%p1699_p4), %s360_s1, 256  }
  0x36   : > { %1562 = vsyncadd (%p1699_p4), %s360_s1, 4294967040 }
  0x37   : > { %1564 = dma.done.wait (%p1689_p1), [#allocation6], 272  }
  0x38   : > { %1566 = vsyncadd (%p1689_p1), [#allocation6], 4294967024 }
  0x39   : > { %1568 = dma.done.wait (%p1689_p1), [#allocation9], 512  }
  0x3a   : > { %1570 = vsyncadd (%p1689_p1), [#allocation9], 4294966784  ;;  %vm461_vm0 = vcmask 261120   ;;  %v457_v0 = vld [vmem:[%s363_s25] sm:$0xff]  ;;  %v458_v2 = vld [vmem:[%s363_s25 + $0x8] sm:$0xff]  ;;  %v1607_v4 = vmov 32.0  }
  0x3b   : > { %v462_v1 = vsel %vm461_vm0, %v457_v0, 0.0  ;;  %v465_v3 = vsel %vm461_vm0, %v458_v2, 0.0  ;;  %1351 = vrcp.f32 %v1607_v4  ;;  %v1215_v21 = vld [vmem:[#allocation7 + $0x8] sm:$0xff]  ;;  %v1217_v22 = vld [vmem:[#allocation8 + $0x8] sm:$0xff]  ;;  %v1214_v25 = vld [vmem:[#allocation7] sm:$0xff]  ;;  %vm811_vm8 = vcmask 125952  }
  0x3c   : > { %463 = vadd.xlane.f32.xlu0 %v462_v1  ;;  %v1219_v23 = vld [vmem:[#allocation10 + $0x8] sm:$0xff]  ;;  %549 = vmatpush.bf16.msra.mxu0 %v1215_v21  ;;  %v1216_v26 = vld [vmem:[#allocation8] sm:$0xff]  ;;  %v1218_v28 = vld [vmem:[#allocation10] sm:$0xff]  ;;  %s1807_s15 = scalar_lea.vmem [#allocation11], %s1169_s4  ;;  %s1220_s20 = sshll.u32 %s1589_s30, 4 }
  0x3d   : > { %579 = vmatpush.bf16.msra.mxu1 %v1217_v22  ;;  %609 = vmatpush.bf16.msra.mxu2 %v1219_v23  ;;  %v1349_v46 = vld [vmem:[#allocation5] ss:$0 sm:$0xff]  ;;  %s952_s16 = sshll.u32 %s1807_s15, 4  ;;  %s951_s21 = scalar_lea.hbm %s1910_s7, %s1220_s20  ;;  %s953_s16 = int_to_ptr.vmem [resolvable:$true] %s952_s16 }
  0x3e   : > { %v1350_v51 = vld [vmem:[%s1905_s2] ss:$0 sm:$0xff]  ;;  %s954_s24 = sshll.u32 %s951_s21, 4  ;;  %s926_s22 = scalar_lea.sflag [#allocation4], %s1777_s12  ;;  %s955_s24 = int_to_ptr.hbm [resolvable:$true] %s954_s24 }
  0x3f   : > { %s1521_s11 = sshra.s32 %s955_s24, 4  ;;  %s1527_s4 = scalar_lea.hbm %s1910_s7, 32  ;;  %s1522_s11 = int_to_ptr.hbm [resolvable:$true] %s1521_s11 }
  0x40   : > { %550 = vmatpush.bf16.msra.mxu0 %v1214_v25  ;;  %s1523_s17 = scalar_lea.hbm %s1522_s11, 16  ;;  %p1528_p11 = scmp.lt.s32.totalorder %s1522_s11, %s1910_s7 }
  0x41   : > { %v1352_v5 = vpop.eup %1351  ;;  %580 = vmatpush.bf16.msra.mxu1 %v1216_v26  ;;  %610 = vmatpush.bf16.msra.mxu2 %v1218_v28  ;;  %p1524_p1 = scmp.ne.s32.totalorder %s1522_s11, %s1523_s17  ;;  %p1529_p12 = scmp.lt.s32.totalorder %s1527_s4, %s1523_s17 }
  0x42   : > { %v469_v6 = vmul.f32 32.0, %v1352_v5  ;;  %vm473_vm1 = vweird.f32 %v1352_v5 }
  0x43   : > { %p1525_p4 = pnand %p1524_p1, %p1756_p7  ;;  %p1530_p13 = por %p1529_p12, %p1528_p11 }
  0x44   : > { %466 = vadd.xlane.f32.xlu0 %v465_v3  ;;  %v470_v7 = vsub.f32 1.0, %v469_v6 }
  0x45   : > { %p1526_p8 = pneg %p1525_p4 }
  0x46   : > { %v471_v8 = vmul.f32 %v1352_v5, %v470_v7 }
  0x47   : > { %p1531_p0 = pnand %p1530_p13, %p1526_p8 }
  0x48   : > { %v472_v9 = vadd.f32 %v1352_v5, %v471_v8 }
  0x4a   : > { %v474_v10 = vsel %vm473_vm1, %v1352_v5, %v472_v9 }
  0xaf   : > { %v464_v11 = vpop.xlane.xlu0 %463 }
  0xb0   : > { %v475_v12 = vmul.f32 %v474_v10, %v464_v11 }
  0xb2   : > { %v477_v13 = vsub.f32 %v457_v0, %v475_v12 }
  0xb4   : > { %v479_v14 = vmul.f32 %v477_v13, %v477_v13 }
  0xb6   : > { %v481_v15 = vsel %vm461_vm0, %v479_v14, 0.0 }
  0xb7   : > { %482 = vadd.xlane.f32.xlu1 %v481_v15  ;;  %v467_v16 = vpop.xlane.xlu0 %466 }
  0xb8   : > { %v476_v17 = vmul.f32 %v474_v10, %v467_v16 }
  0xba   : > { %v478_v18 = vsub.f32 %v458_v2, %v476_v17 }
  0xbc   : > { %v480_v19 = vmul.f32 %v478_v18, %v478_v18 }
  0xbe   : > { %v484_v20 = vsel %vm461_vm0, %v480_v19, 0.0 }
  0xbf   : > { %485 = vadd.xlane.f32.xlu1 %v484_v20 }
 0x12a   : > { %v483_v24 = vpop.xlane.xlu1 %482 }
 0x12b   : > { %v487_v27 = vmul.f32 %v483_v24, %v474_v10 }
 0x12d   : > { %v489_v29 = vadd.f32 1e-05, %v487_v27 }
 0x12f   : > { %1353 = vrsqrt.f32 %v489_v29  ;;  %vm497_vm3 = vweird.f32 %v489_v29 }
 0x132   : > { %v486_v30 = vpop.xlane.xlu1 %485 }
 0x133   : > { %v488_v31 = vmul.f32 %v486_v30, %v474_v10 }
 0x135   : > { %v1354_v32 = vpop.eup %1353  ;;  %v490_v33 = vadd.f32 1e-05, %v488_v31 }
 0x136   : > { %v492_v34 = vmul.f32 %v1354_v32, %v489_v29  ;;  %vm498_vm2 = vweird.f32 %v1354_v32 }
 0x137   : > { %1355 = vrsqrt.f32 %v490_v33  ;;  %vm499_vm4 = vmor %vm497_vm3, %vm498_vm2  ;;  %vm507_vm6 = vweird.f32 %v490_v33 }
 0x138   : > { %v493_v35 = vmul.f32 %v1354_v32, %v492_v34 }
 0x13a   : > { %v494_v36 = vmul.f32 0.5, %v493_v35 }
 0x13c   : > { %v495_v37 = vsub.f32 1.5, %v494_v36 }
 0x13d   : > { %v1356_v38 = vpop.eup %1355 }
 0x13e   : > { %v496_v39 = vmul.f32 %v1354_v32, %v495_v37  ;;  %v502_v40 = vmul.f32 %v1356_v38, %v490_v33  ;;  %vm508_vm5 = vweird.f32 %v1356_v38 }
 0x13f   : > { %vm509_vm7 = vmor %vm507_vm6, %vm508_vm5 }
 0x140   : > { %v503_v41 = vmul.f32 %v1356_v38, %v502_v40  ;;  %v500_v42 = vsel %vm499_vm4, %v1354_v32, %v496_v39 }
 0x141   : > { %v511_v45 = vmul.f32 %v500_v42, %v477_v13 }
 0x142   : > { %v504_v43 = vmul.f32 0.5, %v503_v41 }
 0x143   : > { %v516_v50 = vmul.f32 %v1349_v46, %v511_v45 }
 0x144   : > { %v505_v44 = vsub.f32 1.5, %v504_v43 }
 0x145   : > { %v521_v53 = vadd.f32 %v1350_v51, %v516_v50 }
 0x146   : > { %v506_v47 = vmul.f32 %v1356_v38, %v505_v44 }
 0x148   : > { %v510_v48 = vsel %vm509_vm7, %v1356_v38, %v506_v47 }
 0x149   : > { %v512_v49 = vmul.f32 %v510_v48, %v478_v18 }
 0x14b   : > { %v517_v52 = vmul.f32 %v1349_v46, %v512_v49 }
 0x14d   : > { %v522_v54 = vadd.f32 %v1350_v51, %v517_v52 }
 0x14f   : > { %v523_v55 = vpack.c.bf16 %v522_v54, %v521_v53 }
 0x151   : > { %1187 = vmatmul.msk.bf16.vlgmr.msra.gmra.mxu0 %vm461_vm0, %v523_v55  ;;  %1196 = vmatmul.msk.bf16.vlgmr.msra.gmra.mxu1 %vm461_vm0, %v523_v55 }
 0x152   : > { %1205 = vmatmul.msk.bf16.vlgmr.msra.gmra.mxu2 %vm461_vm0, %v523_v55 }
 0x1ce   : > { %v552_v56 = vpop.f32.mrf.mxu0  ;;  %v582_v57 = vpop.f32.mrf.mxu1 }
 0x1d5   : > { %v612_v62 = vpop.f32.mrf.mxu2 }
 0x1d6   : > { %v554_v58 = vpop.f32.mrf.mxu0  ;;  %v584_v59 = vpop.f32.mrf.mxu1 }
 0x1d7   : > { %v617_v60 = vpack.c.bf16 %v554_v58, %v552_v56  ;;  %v648_v61 = vpack.c.bf16 %v584_v59, %v582_v57 }
 0x1d9   : > { %1332 = vxpose.binary.xlu2.c.b16.start.end [1/2] (short) (narrow) %v648_v61, %v617_v60, 32 }
 0x1dd   : > { %v614_v63 = vpop.f32.mrf.mxu2 }
 0x1de   : > { %v665_v0 = vpack.c.bf16 %v614_v63, %v612_v62 }
 0x1f9   : > { %666 = vxpose.xlu2.c.b16.start.end [1/1] (short) (narrow) %v665_v0, 32 }
 0x27a   : > { %v1333_v1 = vpop.trf.xlu2 }
 0x27b   : > { %v636_v2 = vunpack.c.l.b16 %v1333_v1  ;;  %v637_v3 = vunpack.c.h.b16 %v1333_v1 }
 0x27d   : > { %v640_v4 = vpack.c.b16 %v636_v2, %v636_v2  ;;  %v641_v5 = vpack.c.b16 %v637_v3, %v637_v3 }
 0x27f   : > { %1337 = vxpose.binary.xlu0.c.b16.start.end [1/2] (short) (narrow) %v641_v5, %v640_v4, 16 }
 0x282   : > { %v1334_v6 = vpop.trf.xlu2 }
 0x283   : > { %v799_v7 = vunpack.c.l.b16 %v1334_v6  ;;  %v800_v8 = vunpack.c.h.b16 %v1334_v6 }
 0x285   : > { %v803_v9 = vpack.c.b16 %v799_v7, %v799_v7  ;;  %v804_v10 = vpack.c.b16 %v800_v8, %v800_v8 }
 0x287   : > { %812 = vst.msk [vmem:[%s1807_s15] sm:$0xf] %vm811_vm8, %v803_v9 }
 0x288   : > { %813 = vst.msk [vmem:[%s1807_s15 + $0x4] sm:$0xf] %vm811_vm8, %v804_v10 }
 0x28a   : > { %v1335_v11 = vpop.trf.xlu2 }
 0x28b   : > { %v638_v12 = vunpack.c.l.b16 %v1335_v11  ;;  %v639_v13 = vunpack.c.h.b16 %v1335_v11 }
 0x28d   : > { %v642_v14 = vpack.c.b16 %v638_v12, %v638_v12  ;;  %v643_v15 = vpack.c.b16 %v639_v13, %v639_v13 }
 0x28f   : > { %1340 = vxpose.binary.xlu1.c.b16.start.end [1/2] (short) (narrow) %v643_v15, %v642_v14, 16 }
 0x292   : > { %v1336_v16 = vpop.trf.xlu2 }
 0x293   : > { %v801_v17 = vunpack.c.l.b16 %v1336_v16  ;;  %v802_v18 = vunpack.c.h.b16 %v1336_v16 }
 0x295   : > { %v805_v19 = vpack.c.b16 %v801_v17, %v801_v17  ;;  %v806_v20 = vpack.c.b16 %v802_v18, %v802_v18 }
 0x297   : > { %814 = vst.msk [vmem:[%s1807_s15 + $0x8] sm:$0xf] %vm811_vm8, %v805_v19 }
 0x298   : > { %815 = vst.msk [vmem:[%s1807_s15 + $0xc] sm:$0xf] %vm811_vm8, %v806_v20 }
 0x29a   : > { %v674_v21 = vpop.trf.xlu2 }
 0x29b   : > { %v684_v22 = vunpack.c.l.b16 %v674_v21  ;;  %v685_v23 = vunpack.c.h.b16 %v674_v21 }
 0x29d   : > { %v688_v24 = vpack.c.b16 %v684_v22, %v684_v22  ;;  %v689_v25 = vpack.c.b16 %v685_v23, %v685_v23 }
 0x29f   : > { %1343 = vxpose.binary.xlu2.c.b16.start.end [1/2] (short) (narrow) %v689_v25, %v688_v24, 16 }
 0x2aa   : > { %v675_v26 = vpop.trf.xlu2 }
 0x2ab   : > { %v686_v27 = vunpack.c.l.b16 %v675_v26  ;;  %v687_v28 = vunpack.c.h.b16 %v675_v26 }
 0x2ad   : > { %v690_v29 = vpack.c.b16 %v686_v27, %v686_v27  ;;  %v691_v30 = vpack.c.b16 %v687_v28, %v687_v28 }
 0x2af   : > { %1346 = vxpose.binary.xlu0.c.b16.start.end [1/2] (short) (narrow) %v691_v30, %v690_v29, 16 }
 0x2b0   : > { %1534 = shalt.err (!%p1531_p0)
}
 0x2b1   : > { %s1608_s12 = smov 64   ;;  %s1609_s5 = smov 4   ;;  %vm788_vm9 = vcmask 60416  }
 0x2b2   : > { %1239 = dma.vmem_to_hbm [thread:$0]  (%p1756_p7), %s953_s16, 256, %s955_s24, %s926_s22, %s1608_s12, %s1608_s12, %s1609_s5  }
 0x2b3   : > { %p437_p3 = scmp.lt.s32.totalorder %s1589_s30, 1 }
 0x2b5   : > { %s1942_s30 = smov (!%p437_p3, %s1589_s30), 1 }
 0x2b6   : > { %s1212_s13 = sshll.u32 %s1942_s30, 5 }
 0x2b7   : > { %s1841_s26 = scalar_lea.vmem %s1909_s6, %s1212_s13  ;;  %s1858_s16 = scalar_lea.vmem %s1911_s8, %s1212_s13 }
 0x32b   : > { %v1338_v31 = vpop.trf.xlu0 }
 0x32c   : > { %v764_v32 = vunpack.c.l.b16 %v1338_v31  ;;  %v765_v33 = vunpack.c.h.b16 %v1338_v31 }
 0x32e   : > { %v772_v34 = vpack.c.b16 %v764_v32, %v764_v32  ;;  %v773_v35 = vpack.c.b16 %v765_v33, %v765_v33 }
 0x330   : > { %789 = vst.msk [vmem:[%s1841_s26] sm:$0xf] %vm788_vm9, %v772_v34 }
 0x331   : > { %790 = vst.msk [vmem:[%s1841_s26 + $0x4] sm:$0xf] %vm788_vm9, %v773_v35 }
 0x333   : > { %v1339_v36 = vpop.trf.xlu0 }
 0x334   : > { %v766_v37 = vunpack.c.l.b16 %v1339_v36  ;;  %v767_v38 = vunpack.c.h.b16 %v1339_v36 }
 0x336   : > { %v774_v39 = vpack.c.b16 %v766_v37, %v766_v37  ;;  %v775_v40 = vpack.c.b16 %v767_v38, %v767_v38 }
 0x338   : > { %791 = vst.msk [vmem:[%s1841_s26 + $0x8] sm:$0xf] %vm788_vm9, %v774_v39 }
 0x339   : > { %792 = vst.msk [vmem:[%s1841_s26 + $0xc] sm:$0xf] %vm788_vm9, %v775_v40 }
 0x33b   : > { %v1341_v41 = vpop.trf.xlu1 }
 0x33c   : > { %v768_v42 = vunpack.c.l.b16 %v1341_v41  ;;  %v769_v43 = vunpack.c.h.b16 %v1341_v41 }
 0x33e   : > { %v776_v44 = vpack.c.b16 %v768_v42, %v768_v42  ;;  %v777_v45 = vpack.c.b16 %v769_v43, %v769_v43 }
 0x340   : > { %793 = vst.msk [vmem:[%s1841_s26 + $0x10] sm:$0xf] %vm788_vm9, %v776_v44  ;;  %v1344_v46 = vpop.trf.xlu2 }
 0x341   : > { %794 = vst.msk [vmem:[%s1841_s26 + $0x14] sm:$0xf] %vm788_vm9, %v777_v45  ;;  %v884_v47 = vunpack.c.l.b16 %v1344_v46  ;;  %v885_v48 = vunpack.c.h.b16 %v1344_v46 }
 0x343   : > { %v892_v49 = vpack.c.b16 %v884_v47, %v884_v47  ;;  %v893_v50 = vpack.c.b16 %v885_v48, %v885_v48  ;;  %v1342_v51 = vpop.trf.xlu1 }
 0x344   : > { %v770_v52 = vunpack.c.l.b16 %v1342_v51  ;;  %v771_v53 = vunpack.c.h.b16 %v1342_v51 }
 0x345   : > { %908 = vst.msk [vmem:[%s1858_s16] sm:$0xf] %vm788_vm9, %v892_v49 }
 0x346   : > { %909 = vst.msk [vmem:[%s1858_s16 + $0x4] sm:$0xf] %vm788_vm9, %v893_v50  ;;  %v778_v54 = vpack.c.b16 %v770_v52, %v770_v52  ;;  %v779_v55 = vpack.c.b16 %v771_v53, %v771_v53 }
 0x348   : > { %795 = vst.msk [vmem:[%s1841_s26 + $0x18] sm:$0xf] %vm788_vm9, %v778_v54  ;;  %v1345_v56 = vpop.trf.xlu2 }
 0x349   : > { %796 = vst.msk [vmem:[%s1841_s26 + $0x1c] sm:$0xf] %vm788_vm9, %v779_v55  ;;  %v886_v57 = vunpack.c.l.b16 %v1345_v56  ;;  %v887_v58 = vunpack.c.h.b16 %v1345_v56 }
 0x34b   : > { %v894_v59 = vpack.c.b16 %v886_v57, %v886_v57  ;;  %v895_v60 = vpack.c.b16 %v887_v58, %v887_v58 }
 0x34d   : > { %910 = vst.msk [vmem:[%s1858_s16 + $0x8] sm:$0xf] %vm788_vm9, %v894_v59 }
 0x34e   : > { %911 = vst.msk [vmem:[%s1858_s16 + $0xc] sm:$0xf] %vm788_vm9, %v895_v60 }
 0x35b   : > { %v1347_v61 = vpop.trf.xlu0 }
 0x35c   : > { %v888_v62 = vunpack.c.l.b16 %v1347_v61  ;;  %v889_v63 = vunpack.c.h.b16 %v1347_v61 }
 0x35e   : > { %v896_v0 = vpack.c.b16 %v888_v62, %v888_v62  ;;  %v897_v1 = vpack.c.b16 %v889_v63, %v889_v63 }
 0x360   : > { %912 = vst.msk [vmem:[%s1858_s16 + $0x10] sm:$0xf] %vm788_vm9, %v896_v0 }
 0x361   : > { %913 = vst.msk [vmem:[%s1858_s16 + $0x14] sm:$0xf] %vm788_vm9, %v897_v1 }
 0x363   : > { %v1348_v2 = vpop.trf.xlu0 }
 0x364   : > { %v890_v3 = vunpack.c.l.b16 %v1348_v2  ;;  %v891_v4 = vunpack.c.h.b16 %v1348_v2 }
 0x366   : > { %v898_v5 = vpack.c.b16 %v890_v3, %v890_v3  ;;  %v899_v6 = vpack.c.b16 %v891_v4, %v891_v4 }
 0x368   : > { %914 = vst.msk [vmem:[%s1858_s16 + $0x18] sm:$0xf] %vm788_vm9, %v898_v5 }
 0x369   : > { %915 = vst.msk [vmem:[%s1858_s16 + $0x1c] sm:$0xf] %vm788_vm9, %v899_v6 }
 0x36a PF: > { %s985_s21 = sand.u32 1, %s1577_s27   ;;  %p1259_p5 = pnand %p1164_p9, %p1704_p6 }
 0x36b   : > { %s986_s24 = scalar_lea.sflag [#allocation4], %s985_s21 }
 0x36c   : > { %p1260_p7 = pneg %p1259_p5 }
 0x36e   : > { %1572 = dma.done.wait (%p1260_p7), %s986_s24, 256  }
 0x36f   : > { %1574 = vsyncadd (%p1260_p7), %s986_s24, 4294967040  ;;  %s27_s10 = sadd.s32 1, %s1597_s10   ;;  %s1933_s22 = sld [smem:[#allocation17_spill]] }
 0x370   : > { %p24_p10 = scmp.ge.s32.totalorder %s27_s10, 4   ;;  %s1934_s27 = smov %s1581_s28 }
 0x371   : > { %s1935_s28 = smov %s1585_s29  ;;  %s1936_s29 = smov %s1765_s19 }
 0x372   : > { %s1937_s30 = smov %s1593_s9  ;;  %26 = sbr.rel (!%p24_p10) target bundleno = 13 (0xd), region = 129 }
 0x375   : > { %s1938_s9 = smov %s1933_s22 }
 0x377   :  { %1004 = vsyncpa [#allocation3], 1 }
 0x378   :  { %1006 = vsyncpa [#allocation3 + $0x1], 1 }
 0x379   :  { %1007 = vsyncpa [#allocation6], 1 }
 0x37a   :  { %1008 = vsyncpa [#allocation9], 1 }
 0x37b   :  { %1009 = vsyncpa [#allocation4], 1 }
 0x37c   :  { %1011 = vsyncpa [#allocation4 + $0x1], 1 }

</bundles_post_ra>
